<compile_context>
chip_gen: v6e
topology: v6e:2x2x1
jax: 0.10.0
libtpu: 0.0.40
codegen_flags: <defaults>
</compile_context>

<pallas_src>
import jax
import jax.numpy as jnp
from jax import lax
from jax.experimental import pallas as pl
from jax.experimental.pallas import tpu as pltpu

# ----------------------------- problem sizes --------------------------------
N, C_IN, H, W = 2, 4, 16, 16      # input (NCHW): [2, 4, 16, 16]
C_HID = 32                        # backbone output channels
C_OUT = 8                         # decoder output channels
KH = KW = 3                       # backbone conv kernel
K_IM2COL = KH * KW * C_IN         # 36  (contracted dim of the fused conv)
HW = H * W                        # 256 (lane-dense spatial axis)
TASK = "semseg"


# ------------------------------- kernel -------------------------------------
def single_task_kernel(p_ref, w1_ref, b1_ref, w2_ref, b2_ref, o_ref):
    """Fused backbone(3x3 conv + ReLU) + decoder(1x1 conv), one batch element.

    p_ref  : (1, K_IM2COL, HW)  im2col'd input, spatial axis lane-dense
    w1_ref : (C_HID, K_IM2COL)  backbone conv weight, pre-transposed
    b1_ref : (C_HID, 1)         backbone bias
    w2_ref : (C_OUT, C_HID)     decoder 1x1 conv weight, pre-transposed
    b2_ref : (C_OUT, 1)         decoder bias
    o_ref  : (1, C_OUT, HW)     output (channels-first, lane-dense)
    """
    patches = p_ref[0]                                             # (36, 256)
    hid = jnp.dot(w1_ref[...], patches,
                  preferred_element_type=jnp.float32)              # (32, 256)
    hid = jnp.maximum(hid + b1_ref[...], 0.0)                      # bias + ReLU
    out = jnp.dot(w2_ref[...], hid,
                  preferred_element_type=jnp.float32) + b2_ref[...]  # (8, 256)
    o_ref[0] = out.astype(o_ref.dtype)


def single_task_model(x_nchw, w1, b1, w2, b2):
    """x_nchw: (N, C_IN, H, W) float32 -> dict {TASK: (N, C_OUT, H, W)}."""
    # --- wrapper-side layout prep (pure XLA, fuses cheaply) ------------------
    # im2col in channels-first order -> (N, KH*KW*C_IN, H*W), lanes = spatial.
    x_pad = jnp.pad(x_nchw, ((0, 0), (0, 0), (1, 1), (1, 1)))
    patches = jnp.stack(
        [x_pad[:, :, kh:kh + H, kw:kw + W]
         for kh in range(KH) for kw in range(KW)],
        axis=1)                                        # (N, 9, C_IN, H, W)
    patches = patches.reshape(N, K_IM2COL, HW)         # (N, 36, 256)

    w1t = w1.reshape(K_IM2COL, C_HID).T                # (32, 36)
    w2t = w2.T                                         # (8, 32)
    b1c = b1.reshape(C_HID, 1)                         # (32, 1)
    b2c = b2.reshape(C_OUT, 1)                         # (8, 1)

    flops = 2 * N * HW * (K_IM2COL * C_HID + C_HID * C_OUT)
    bytes_accessed = 4 * (patches.size + w1t.size + b1c.size
                          + w2t.size + b2c.size + N * C_OUT * HW)

    out_flat = pl.pallas_call(
        single_task_kernel,
        out_shape=jax.ShapeDtypeStruct((N, C_OUT, HW), jnp.float32),
        grid_spec=pltpu.PrefetchScalarGridSpec(
            num_scalar_prefetch=0,
            grid=(N,),
            in_specs=[
                pl.BlockSpec((1, K_IM2COL, HW), lambda n: (n, 0, 0)),
                pl.BlockSpec((C_HID, K_IM2COL), lambda n: (0, 0)),
                pl.BlockSpec((C_HID, 1), lambda n: (0, 0)),
                pl.BlockSpec((C_OUT, C_HID), lambda n: (0, 0)),
                pl.BlockSpec((C_OUT, 1), lambda n: (0, 0)),
            ],
            out_specs=pl.BlockSpec((1, C_OUT, HW), lambda n: (n, 0, 0)),
        ),
        compiler_params=pltpu.CompilerParams(
            dimension_semantics=("parallel",)),
        cost_estimate=pl.CostEstimate(
            flops=flops, transcendentals=0, bytes_accessed=bytes_accessed),
    )(patches, w1t, b1c, w2t, b2c)

    # Pure reshape (no transpose) back to NCHW.
    out_nchw = out_flat.reshape(N, C_OUT, H, W)
    return {TASK: out_nchw}


# ----------------------------- reference (JAX) -------------------------------
def reference(x_nchw, w1, b1, w2, b2):
    # backbone: 3x3 conv, padding=1, + ReLU  (NCHW, weight OIHW like PyTorch)
    w1_oihw = jnp.transpose(w1, (3, 2, 0, 1))                 # (C_HID, C_IN, 3, 3)
    h = lax.conv_general_dilated(
        x_nchw, w1_oihw, window_strides=(1, 1), padding="SAME",
        dimension_numbers=("NCHW", "OIHW", "NCHW"))
    h = jnp.maximum(h + b1[None, :, None, None], 0.0)
    # decoder: 1x1 conv
    w2_oihw = jnp.transpose(w2, (1, 0))[:, :, None, None]     # (C_OUT, C_HID, 1, 1)
    o = lax.conv_general_dilated(
        h, w2_oihw, window_strides=(1, 1), padding="VALID",
        dimension_numbers=("NCHW", "OIHW", "NCHW"))
    return o + b2[None, :, None, None]


# --------------------------------- main --------------------------------------
if __name__ == "__main__":
    key = jax.random.PRNGKey(0)
    kx, k1, kb1, k2, kb2 = jax.random.split(key, 5)

    x = jax.random.normal(kx, (N, C_IN, H, W), dtype=jnp.float32)
    w1 = jax.random.normal(k1, (KH, KW, C_IN, C_HID), dtype=jnp.float32) * 0.1
    b1 = jax.random.normal(kb1, (C_HID,), dtype=jnp.float32) * 0.1
    w2 = jax.random.normal(k2, (C_HID, C_OUT), dtype=jnp.float32) * 0.1
    b2 = jax.random.normal(kb2, (C_OUT,), dtype=jnp.float32) * 0.1

    out = single_task_model(x, w1, b1, w2, b2)
    got = jax.block_until_ready(out[TASK])

    want = reference(x, w1, b1, w2, b2)
    assert got.shape == (N, C_OUT, H, W)
    assert jnp.allclose(got, want, atol=1e-4, rtol=1e-4), "mismatch vs reference"

    print("KERNEL_OK")
</pallas_src>

<mosaic_0001>
module attributes {stable_mosaic.version = 11 : i64} {
  func.func @single_task_kernel(%arg0: i32, %arg1: memref<1x36x256xf32, #tpu.memory_space<vmem>>, %arg2: memref<32x36xf32, #tpu.memory_space<vmem>>, %arg3: memref<32x1xf32, #tpu.memory_space<vmem>>, %arg4: memref<8x32xf32, #tpu.memory_space<vmem>>, %arg5: memref<8x1xf32, #tpu.memory_space<vmem>>, %arg6: memref<1x8x256xf32, #tpu.memory_space<vmem>>) attributes {dimension_semantics = [#tpu.dimension_semantics<parallel>], iteration_bounds = array<i64: 2>, scalar_prefetch = 0 : i64, scratch_operands = 0 : i64, tpu.core_type = #tpu.core_type<tc>, window_params = [{transform_indices = @transform_0, window_bounds = array<i64: 1, 36, 256>}, {pipeline_mode = #tpu.pipeline_mode<synchronous>, transform_indices = @transform_1, window_bounds = array<i64: 32, 36>}, {pipeline_mode = #tpu.pipeline_mode<synchronous>, transform_indices = @transform_2, window_bounds = array<i64: 32, 1>}, {pipeline_mode = #tpu.pipeline_mode<synchronous>, transform_indices = @transform_3, window_bounds = array<i64: 8, 32>}, {pipeline_mode = #tpu.pipeline_mode<synchronous>, transform_indices = @transform_4, window_bounds = array<i64: 8, 1>}, {transform_indices = @transform_5, window_bounds = array<i64: 1, 8, 256>}]} {
    %c0 = arith.constant 0 : index
    %c0_0 = arith.constant 0 : index
    %c0_1 = arith.constant 0 : index
    %0 = vector.load %arg1[%c0, %c0_0, %c0_1] : memref<1x36x256xf32, #tpu.memory_space<vmem>>, vector<1x36x256xf32>
    %1 = vector.shape_cast %0 : vector<1x36x256xf32> to vector<36x256xf32>
    %c0_2 = arith.constant 0 : index
    %c0_3 = arith.constant 0 : index
    %2 = vector.load %arg2[%c0_2, %c0_3] : memref<32x36xf32, #tpu.memory_space<vmem>>, vector<32x36xf32>
    %cst = arith.constant dense<0.000000e+00> : vector<32x256xf32>
    %3 = tpu.matmul %2, %1, %cst {dimension_numbers = #tpu.dot_dimension_numbers<[1], [0], [0], [1], [0, 0, 1, 1], [], []>} : vector<32x36xf32>, vector<36x256xf32>, vector<32x256xf32> -> vector<32x256xf32>
    %c0_4 = arith.constant 0 : index
    %c0_5 = arith.constant 0 : index
    %4 = vector.load %arg3[%c0_4, %c0_5] : memref<32x1xf32, #tpu.memory_space<vmem>>, vector<32x1xf32>
    %5 = vector.broadcast %4 : vector<32x1xf32> to vector<32x256xf32>
    %6 = arith.addf %3, %5 : vector<32x256xf32>
    %cst_6 = arith.constant 0.000000e+00 : f32
    %7 = vector.broadcast %cst_6 : f32 to vector<32x256xf32>
    %8 = arith.maximumf %6, %7 : vector<32x256xf32>
    %c0_7 = arith.constant 0 : index
    %c0_8 = arith.constant 0 : index
    %9 = vector.load %arg4[%c0_7, %c0_8] : memref<8x32xf32, #tpu.memory_space<vmem>>, vector<8x32xf32>
    %cst_9 = arith.constant dense<0.000000e+00> : vector<8x256xf32>
    %10 = tpu.matmul %9, %8, %cst_9 {dimension_numbers = #tpu.dot_dimension_numbers<[1], [0], [0], [1], [0, 0, 1, 1], [], []>} : vector<8x32xf32>, vector<32x256xf32>, vector<8x256xf32> -> vector<8x256xf32>
    %c0_10 = arith.constant 0 : index
    %c0_11 = arith.constant 0 : index
    %11 = vector.load %arg5[%c0_10, %c0_11] : memref<8x1xf32, #tpu.memory_space<vmem>>, vector<8x1xf32>
    %12 = vector.broadcast %11 : vector<8x1xf32> to vector<8x256xf32>
    %13 = arith.addf %10, %12 : vector<8x256xf32>
    %c0_12 = arith.constant 0 : index
    %c0_13 = arith.constant 0 : index
    %c0_14 = arith.constant 0 : index
    %14 = vector.load %arg6[%c0_12, %c0_13, %c0_14] : memref<1x8x256xf32, #tpu.memory_space<vmem>>, vector<1x8x256xf32>
    %15 = vector.shape_cast %14 : vector<1x8x256xf32> to vector<8x256xf32>
    %16 = vector.shape_cast %13 : vector<8x256xf32> to vector<1x8x256xf32>
    tpu.vector_store %arg6[%c0_12, %c0_13, %c0_14], %16 {strides = array<i32>} : memref<1x8x256xf32, #tpu.memory_space<vmem>>, vector<1x8x256xf32>,
    return
  }
  func.func @transform_0(%arg0: i32) -> (i32, i32, i32) {
    %c0_i32 = arith.constant 0 : i32
    %c0_i32_0 = arith.constant 0 : i32
    %c0_i32_1 = arith.constant 0 : i32
    return %arg0, %c0_i32, %c0_i32_0 : i32, i32, i32
  }
  func.func @transform_1(%arg0: i32) -> (i32, i32) {
    %c0_i32 = arith.constant 0 : i32
    %c0_i32_0 = arith.constant 0 : i32
    %c0_i32_1 = arith.constant 0 : i32
    return %c0_i32, %c0_i32_0 : i32, i32
  }
  func.func @transform_2(%arg0: i32) -> (i32, i32) {
    %c0_i32 = arith.constant 0 : i32
    %c0_i32_0 = arith.constant 0 : i32
    %c0_i32_1 = arith.constant 0 : i32
    return %c0_i32, %c0_i32_0 : i32, i32
  }
  func.func @transform_3(%arg0: i32) -> (i32, i32) {
    %c0_i32 = arith.constant 0 : i32
    %c0_i32_0 = arith.constant 0 : i32
    %c0_i32_1 = arith.constant 0 : i32
    return %c0_i32, %c0_i32_0 : i32, i32
  }
  func.func @transform_4(%arg0: i32) -> (i32, i32) {
    %c0_i32 = arith.constant 0 : i32
    %c0_i32_0 = arith.constant 0 : i32
    %c0_i32_1 = arith.constant 0 : i32
    return %c0_i32, %c0_i32_0 : i32, i32
  }
  func.func @transform_5(%arg0: i32) -> (i32, i32, i32) {
    %c0_i32 = arith.constant 0 : i32
    %c0_i32_0 = arith.constant 0 : i32
    %c0_i32_1 = arith.constant 0 : i32
    return %arg0, %c0_i32, %c0_i32_0 : i32, i32, i32
  }
}

</mosaic_0001>

<bundles_post_ra>
// kernel: tpu_custom_call.1
= control target key start
LH: loop header
LB: loop body
LE: loop exit
PB: predicated region body
PF: predicated region fallthrough
CT: control target
= control target key end

     0   :  { %10 = vsyncpa [#allocation3], 0  ;;  %s811_s0 = inlined_call_operand.vmem [shape: f32[2,36,256], index: 0, kind: input, shape index: {}]   ;;  %s812_s1 = inlined_call_operand.vmem [shape: f32[32,36], index: 1, kind: input, shape index: {}]   ;;  %s813_s2 = inlined_call_operand.vmem [shape: f32[32,1], index: 2, kind: input, shape index: {}]   ;;  %s814_s3 = inlined_call_operand.vmem [shape: f32[8,32], index: 3, kind: input, shape index: {}]   ;;  %s815_s4 = inlined_call_operand.vmem [shape: f32[8,1], index: 4, kind: input, shape index: {}]   ;;  %s816_s5 = inlined_call_operand.hbm [shape: f32[2,8,256], index: 5, kind: output, shape index: {}]  }
   0x1   :  { %12 = vsyncpa [#allocation3 + $0x1], 0  ;;  %s694_s18 = smov 0   ;;  %s696_s19 = smov 0  }
   0x2   :  { %s698_s20 = smov 0   ;;  %s700_s21 = smov 0  }
   0x3 LB: > { %s715_s22 = sadd.s32 4294967295, %s659_s21   ;;  %s536_s23 = sadd.s32 4294967294, %s659_s21   ;;  %s659_s21 = sphi %s700_s21, %s822_s21   ;;  %s655_s20 = sphi %s698_s20, %s821_s20   ;;  %s651_s19 = sphi %s696_s19, %s820_s19   ;;  %s647_s18 = sphi %s694_s18, %s819_s18  }
   0x4   : > { %s719_s24 = sadd.s32 1, %s659_s21   ;;  %s135_s25 = sadd.s32 1, %s655_s20 }
   0x5   : > { %s132_s26 = ssub.s32 %s659_s21, %s719_s24  ;;  %p145_p0 = scmp.ne.s32.totalorder %s655_s20, %s651_s19 }
   0x6   : > { %p133_p1 = scmp.eq.s32.totalorder %s132_s26, 0  ;;  %p146_p2 = scmp.eq.s32.totalorder %s715_s22, 1 }
   0x7   : > { %p151_p3 = scmp.ne.s32.totalorder %s651_s19, %s647_s18  ;;  %p152_p4 = scmp.eq.s32.totalorder %s536_s23, 1 }
   0x8   : > { %s730_s27 = scalar_select %p133_p1, %s655_s20, %s135_s25  }
   0x9   : > { %p732_p5 = por %p146_p2, %p145_p0  ;;  %p736_p6 = por %p152_p4, %p151_p3 }
   0xa   : > { %p539_p7 = scmp.ge.s32.totalorder %s659_s21, 1  ;;  %p190_p8 = scmp.lt.s32.totalorder %s659_s21, 3 }
   0xc   : > { %p191_p9 = pnand %p539_p7, %p190_p8 }
   0xd   : > { %p218_p10 = scmp.lt.s32.totalorder (!%p191_p9), %s715_s22, 1  ;;  %s215_s14 = sand.u32 (!%p191_p9), 1, %s651_s19  }
   0xe   : > { %194 = sbr.rel (%p191_p9) target bundleno = 465 (0x1d1), region = 40  ;;  %s540_s15 = sshll.u32 (!%p191_p9), %s215_s14, 4 }
   0xf   : > { %s554_s16 = sshll.u32 (!%p191_p9), %s715_s22, 8  ;;  %s463_s6 = scalar_lea.sflag (!%p191_p9), [#allocation3], %s215_s14 }
  0x10   : > { %s475_s30 = scalar_lea.hbm (!%p191_p9), %s816_s5, %s554_s16  ;;  %s663_s8 = smov (!%p191_p9), [#allocation2]  }
  0x13   : > { %v661_v0 = vmov 0.0   ;;  %v238_v1 = vld [vmem:[%s813_s2 + $0x8] sm:$0xff]  ;;  %s219_s7 = scalar_select %p218_p10, %s715_s22, 1  ;;  %v662_v2 = vmov 0   ;;  %v240_v3 = vld [vmem:[%s813_s2 + $0x18] sm:$0xff]  ;;  %v237_v4 = vld [vmem:[%s813_s2] sm:$0xff] }
  0x14   : > { %345 = vmatprep.mubr.f32.mxu0 %v661_v0  ;;  %453 = vmatprep.mubr.f32.mxu1 %v661_v0  ;;  %v239_v5 = vld [vmem:[%s813_s2 + $0x10] sm:$0xff]  ;;  %vm274_vm0 = vcmask 1043456   ;;  %v379_v10 = vld [vmem:[%s815_s4] sm:$0xff]  ;;  %vm261_vm1 = vcmask 293888   ;;  %v234_v18 = vld [vmem:[%s812_s1 + $0x8] sm:$0xff]  ;;  %vm385_vm2 = vcmask 261120  }
  0x15   : > { %598 = vset.pattern.permute.xlu1 %v662_v2  ;;  %597 = vset.pattern.permute.xlu0 %v662_v2  ;;  %s555_s10 = smul.u32 80, %s219_s7  ;;  %v233_v17 = vld [vmem:[%s812_s1] sm:$0xff]  ;;  %v235_v19 = vld [vmem:[%s812_s1 + $0x10] sm:$0xff]  ;;  %v236_v20 = vld [vmem:[%s812_s1 + $0x18] sm:$0xff]  ;;  %s603_s22 = sshll.u32 %s663_s8, 4  ;;  %s604_s22 = int_to_ptr.vmem [resolvable:$false] %s603_s22 }
  0x16   : > { %248 = vperm.xlu1 %598, %v238_v1   ;;  %258 = vperm.xlu0 %597, %v240_v3   ;;  %v378_v49 = vld [vmem:[%s814_s3] sm:$0xff]  ;;  %s605_s9 = scalar_lea.vmem %s604_s22, 512 }
  0x17   : > { %s222_s17 = scalar_lea.vmem %s811_s0, %s555_s10 }
  0x18   : > { %v232_v6 = vld [vmem:[%s222_s17 + $0x48] sm:$0xf]  ;;  %v231_v7 = vld [vmem:[%s222_s17 + $0x40] sm:$0xf]  ;;  %v230_v8 = vld [vmem:[%s222_s17 + $0x38] sm:$0xff] }
  0x19   : > { %542 = vmatprep.subr.msk.mxu0 %vm274_vm0, %v232_v6  ;;  %v229_v9 = vld [vmem:[%s222_s17 + $0x30] sm:$0xff]  ;;  %v228_v11 = vld [vmem:[%s222_s17 + $0x28] sm:$0xff]  ;;  %v227_v12 = vld [vmem:[%s222_s17 + $0x20] sm:$0xff] }
  0x1a   : > { %243 = vperm.xlu1 %598, %v237_v4   ;;  %253 = vperm.xlu0 %597, %v239_v5   ;;  %v226_v13 = vld [vmem:[%s222_s17 + $0x18] sm:$0xff]  ;;  %v225_v14 = vld [vmem:[%s222_s17 + $0x10] sm:$0xff]  ;;  %v224_v15 = vld [vmem:[%s222_s17 + $0x8] sm:$0xff] }
  0x1b   : > { %543 = vmatpush1.msk.msra.mxu0 %vm274_vm0, %v231_v7  ;;  %v223_v16 = vld [vmem:[%s222_s17] sm:$0xff]  ;;  %s217_s17 = scalar_lea.vmem [#allocation2], %s540_s15 }
  0x1c   : > { %305 = vmatprep.subr.mxu0 %v230_v8  ;;  %s477_s23 = sshll.u32 %s217_s17, 4  ;;  %s478_s23 = int_to_ptr.vmem [resolvable:$true] %s477_s23 }
  0x1d   : > { %306 = vmatpush1.msra.mxu0 %v229_v9  ;;  %s599_s7 = scalar_lea.vmem %s478_s23, 256  ;;  %p606_p0 = scmp.lt.s32.totalorder %s478_s23, %s604_s22 }
  0x1e   : > { %382 = vperm.xlu0 %597, %v379_v10   ;;  %307 = vmatprep.subr.mxu0 %v228_v11  ;;  %p600_p11 = scmp.ne.s32.totalorder %s478_s23, %s599_s7  ;;  %p607_p1 = scmp.lt.s32.totalorder %s605_s9, %s599_s7 }
  0x1f   : > { %308 = vmatpush1.msra.mxu0 %v227_v12 }
  0x20   : > { %309 = vmatprep.subr.mxu0 %v226_v13  ;;  %p601_p12 = pnand %p600_p11, %p732_p5  ;;  %p608_p2 = por %p607_p1, %p606_p0 }
  0x21   : > { %310 = vmatpush1.msra.mxu0 %v225_v14 }
  0x22   : > { %311 = vmatprep.subr.mxu0 %v224_v15  ;;  %p602_p13 = pneg %p601_p12 }
  0x23   : > { %312 = vmatpush1.msra.mxu0 %v223_v16 }
  0x24   : > { %544 = vmatmul.mubr.msk.f32.vlgmr.msra.gmra.mxu0 %vm261_vm1, %v233_v17  ;;  %p609_p3 = pnand %p608_p2, %p602_p13 }
  0x25   : > { %351 = vmatprep.mubr.f32.mxu0 %v661_v0 }
  0x28   : > { %545 = vmatmul.mubr.msk.f32.gmra.mxu0 %vm261_vm1, %v234_v18 }
  0x29   : > { %357 = vmatprep.mubr.f32.mxu0 %v661_v0 }
  0x2c   : > { %546 = vmatmul.mubr.msk.f32.gmra.mxu0 %vm261_vm1, %v235_v19 }
  0x2d   : > { %363 = vmatprep.mubr.f32.mxu0 %v661_v0 }
  0x30   : > { %547 = vmatmul.mubr.msk.f32.gmra.mxu0 %vm261_vm1, %v236_v20 }
  0x91   : > { %v259_v25 = vpop.permute.xlu0 %258  ;;  %v249_v28 = vpop.permute.xlu1 %248 }
  0x95   : > { %v254_v30 = vpop.permute.xlu0 %253  ;;  %v244_v36 = vpop.permute.xlu1 %243 }
  0x99   : > { %v383_v50 = vpop.permute.xlu0 %382 }
  0xe4   : > { %v347_v21 = vpop.f32.mrf.mxu0 }
  0xe5   : > { %v348_v43 = vadd.f32 %v347_v21, %v244_v36 }
  0xe6   : > { %v349_v22 = vpop.f32.mrf.mxu0 }
  0xe7   : > { %v350_v41 = vadd.f32 %v349_v22, %v244_v36  ;;  %v370_v48 = vmax.f32 %v348_v43, 0.0 }
  0xe8   : > { %v353_v23 = vpop.f32.mrf.mxu0 }
  0xe9   : > { %v354_v39 = vadd.f32 %v353_v23, %v249_v28  ;;  %v371_v47 = vmax.f32 %v350_v41, 0.0 }
  0xea   : > { %v355_v24 = vpop.f32.mrf.mxu0 }
  0xeb   : > { %v356_v37 = vadd.f32 %v355_v24, %v249_v28  ;;  %v372_v46 = vmax.f32 %v354_v39, 0.0 }
  0xec   : > { %v359_v26 = vpop.f32.mrf.mxu0 }
  0xed   : > { %v360_v35 = vadd.f32 %v359_v26, %v254_v30  ;;  %v373_v45 = vmax.f32 %v356_v37, 0.0 }
  0xee   : > { %v361_v27 = vpop.f32.mrf.mxu0 }
  0xef   : > { %v362_v33 = vadd.f32 %v361_v27, %v254_v30  ;;  %v374_v44 = vmax.f32 %v360_v35, 0.0 }
  0xf0   : > { %v365_v29 = vpop.f32.mrf.mxu0 }
  0xf1   : > { %v366_v31 = vadd.f32 %v365_v29, %v259_v25  ;;  %v375_v42 = vmax.f32 %v362_v33, 0.0 }
  0xf2   : > { %v367_v32 = vpop.f32.mrf.mxu0 }
  0xf3   : > { %v368_v34 = vadd.f32 %v367_v32, %v259_v25  ;;  %v376_v40 = vmax.f32 %v366_v31, 0.0 }
  0xf5   : > { %v377_v38 = vmax.f32 %v368_v34, 0.0 }
  0xf7   : > { %413 = vmatprep.subr.mxu1 %v377_v38 }
  0xf8   : > { %414 = vmatpush1.msra.mxu1 %v376_v40 }
  0xf9   : > { %415 = vmatprep.subr.mxu1 %v375_v42 }
  0xfa   : > { %416 = vmatpush1.msra.mxu1 %v374_v44 }
  0xfb   : > { %417 = vmatprep.subr.mxu1 %v373_v45 }
  0xfc   : > { %418 = vmatpush1.msra.mxu1 %v372_v46 }
  0xfd   : > { %419 = vmatprep.subr.mxu1 %v371_v47 }
  0xfe   : > { %420 = vmatpush1.msra.mxu1 %v370_v48 }
  0xff   : > { %548 = vmatmul.mubr.msk.f32.vlgmr.msra.gmra.mxu1 %vm385_vm2, %v378_v49 }
 0x1bf   : > { %v455_v51 = vpop.f32.mrf.mxu1 }
 0x1c0   : > { %v456_v52 = vadd.f32 %v455_v51, %v383_v50 }
 0x1c1   : > { %v457_v53 = vpop.f32.mrf.mxu1 }
 0x1c2   : > { %460 = vst [vmem:[%s217_s17] sm:$0xff] %v456_v52  ;;  %v458_v54 = vadd.f32 %v457_v53, %v383_v50 }
 0x1c4   : > { %461 = vst [vmem:[%s217_s17 + $0x8] sm:$0xff] %v458_v54 }
 0x1c5   : > { %612 = shalt.err (!%p609_p3)
}
 0x1c6   : > { %s613_s10 = scalar_lea.hbm %s475_s30, 256  ;;  %s617_s13 = scalar_lea.hbm %s816_s5, 512 }
 0x1c7   : > { %p614_p4 = scmp.ne.s32.totalorder %s475_s30, %s613_s10  ;;  %p618_p9 = scmp.lt.s32.totalorder %s475_s30, %s816_s5 }
 0x1c8   : > { %p619_p10 = scmp.lt.s32.totalorder %s617_s13, %s613_s10 }
 0x1c9   : > { %p615_p7 = pnand %p614_p4, %p732_p5 }
 0x1ca   : > { %p620_p11 = por %p619_p10, %p618_p9 }
 0x1cb   : > { %p616_p8 = pneg %p615_p7 }
 0x1cd   : > { %p621_p12 = pnand %p620_p11, %p616_p8 }
 0x1cf   : > { %624 = shalt.err (!%p621_p12)
}
 0x1d0   : > { %556 = dma.vmem_to_hbm [thread:$0]  (%p732_p5), %s478_s23, 256, %s475_s30, %s463_s6  }
 0x1d1 PF: > { %p562_p13 = scmp.ge.s32.totalorder %s659_s21, 2  ;;  %s489_s16 = sand.u32 1, %s647_s18  }
 0x1d2   : > { %s490_s17 = scalar_lea.sflag [#allocation3], %s489_s16 }
 0x1d3   : > { %p559_p0 = pnand %p562_p13, %p736_p6 }
 0x1d5   : > { %p560_p1 = pneg %p559_p0 }
 0x1d7   : > { %642 = dma.done.wait (%p560_p1), %s490_s17, 256  }
 0x1d8   : > { %644 = vsyncadd (%p560_p1), %s490_s17, 4294967040  ;;  %p15_p2 = scmp.ge.s32.totalorder %s719_s24, 4   ;;  %s819_s18 = smov %s651_s19 }
 0x1d9   : > { %s820_s19 = smov %s655_s20  ;;  %s821_s20 = smov %s730_s27 }
 0x1da   : > { %s822_s21 = smov %s719_s24  ;;  %17 = sbr.rel (!%p15_p2) target bundleno = 3 (0x3), region = 75 }
 0x1df   :  { %495 = vsyncpa [#allocation3], 1 }
 0x1e0   :  { %497 = vsyncpa [#allocation3 + $0x1], 1 }

</bundles_post_ra>
